<compile_context>
chip_gen: v7x
topology: tpu7x:2x2x1
jax: 0.10.0
libtpu: 0.0.40
codegen_flags: <defaults>
</compile_context>

<pallas_src>
import functools

import jax
import jax.numpy as jnp
from jax.experimental import pallas as pl
from jax.experimental.pallas import tpu as pltpu


def _ce_label_smooth_kernel(x_ref, tgt_ref, out_ref, acc_ref, *,
                            epsilon, num_classes, n_total, block_n,
                            tiles_per_chunk, needs_x_mask, needs_row_mask):
    # x_ref:   (TN, C)     logits tile (native dtype, VMEM)
    # tgt_ref: (TN, 1)     i32 labels tile (VMEM)
    # out_ref: (1, 8, 128) f32 per-chunk partial loss tile (VMEM)
    # acc_ref: (1, 1)      f32 running per-chunk sum (SMEM scratch)
    i = pl.program_id(1)
    last = pl.num_programs(1) - 1

    @pl.when(i == 0)
    def _():
        acc_ref[0, 0] = jnp.float32(0.0)

    x = x_ref[...].astype(jnp.float32)          # (TN, C)
    tgt = tgt_ref[...]                          # (TN, 1) i32
    tn, c = x.shape

    valid = None
    if needs_x_mask or needs_row_mask:
        p = pl.program_id(0)
        tile_idx = p * tiles_per_chunk + i      # LOGICAL (unclamped) tile index
        row_local = jax.lax.broadcasted_iota(jnp.int32, (tn, 1), 0)
        row_global = tile_idx * block_n + row_local
        valid = row_global < n_total            # (TN, 1) bool

    if needs_x_mask:
        # Only when the last tile is physically ragged: keep exp/log finite on
        # the undefined overhang rows.
        x = jnp.where(valid, x, 0.0)

    # Numerically stable log-softmax pieces; `shifted` only inside exp->sum.
    m = jnp.max(x, axis=1, keepdims=True)                               # (TN, 1)
    lse = jnp.log(jnp.sum(jnp.exp(x - m), axis=1, keepdims=True))       # (TN, 1)
    norm = m + lse                                                      # (TN, 1)

    # log_p[n, t_n] = x[n, t_n] - norm[n]   (gather via iota compare)
    cls_ids = jax.lax.broadcasted_iota(jnp.int32, (tn, c), 1)
    picked_x = jnp.sum(jnp.where(cls_ids == tgt, x, 0.0),
                       axis=1, keepdims=True)                           # (TN, 1)
    picked_lp = picked_x - norm

    # sum_c log_p[n, c] = sum_c x[n, c] - C * norm[n]
    row_sum_lp = jnp.sum(x, axis=1, keepdims=True) - float(c) * norm    # (TN, 1)

    per_row = ((1.0 - epsilon) * picked_lp
               + (epsilon / float(num_classes)) * row_sum_lp)
    if needs_row_mask:
        per_row = jnp.where(valid, per_row, 0.0)

    acc_ref[0, 0] += -jnp.sum(per_row)

    @pl.when(i == last)
    def _():
        out_ref[...] = jnp.full(out_ref.shape, acc_ref[0, 0], dtype=jnp.float32)


def _round_up(x, m):
    return ((x + m - 1) // m) * m


def _vmem_capacity_bytes():
    try:
        return int(pltpu.get_tpu_info().vmem_capacity_bytes)
    except Exception:
        return 64 << 20     # conservative (v7x-sized) fallback


def _per_row_vmem_bytes(c, itemsize):
    # 2 * c * itemsize : double-buffered native-dtype logits tile
    # 2 * 512          : double-buffered (TN, 1) i32 targets, lane-padded to 128
    # 4 * c * 4        : in-kernel f32 temporaries (x_f32, exp, iota/select)
    return 2 * c * itemsize + 2 * 512 + 4 * c * 4


def _choose_block_n(n, c, itemsize, budget_bytes):
    """Size the batch tile by bytes (not rows) against the real VMEM footprint."""
    row_bytes = _per_row_vmem_bytes(c, itemsize)
    headroom = 2 << 20
    tn = max(8, (budget_bytes - headroom) // row_bytes)
    # Keep the raw logits tile itself in the 12-16 MiB sweet spot.
    tn = min(tn, max(8, (16 << 20) // max(1, c * itemsize)))
    # Never exceed the (sublane-rounded) batch.
    tn = min(tn, _round_up(n, 8))
    # Ensure >= 2 tiles for large batches so the parallel axis can feed 2 TCs (v7x).
    if n >= 4096:
        tn = min(tn, _round_up((n + 1) // 2, 8))
    tn = max(8, (tn // 8) * 8)
    return int(tn)


def cross_entropy_label_smooth(inputs, targets, num_classes, epsilon=0.1,
                               block_n=None):
    """inputs: (N, C) logits (f32/bf16); targets: (N,) int ids. Returns scalar f32."""
    n, c = inputs.shape
    assert c == num_classes
    tgt2d = targets.reshape(n, 1).astype(jnp.int32)

    itemsize = jnp.dtype(inputs.dtype).itemsize
    vmem_cap = _vmem_capacity_bytes()
    budget = min(vmem_cap // 2, 96 << 20)   # 32 MiB on v7x, 64 MiB on v5e/v6e

    if block_n is None:
        block_n = _choose_block_n(n, c, itemsize, budget)
    block_n = int(block_n)

    tiles_total = (n + block_n - 1) // block_n
    num_chunks = 2 if tiles_total >= 2 else 1     # 2 TCs on v7x; neutral elsewhere
    tiles_per_chunk = (tiles_total + num_chunks - 1) // num_chunks

    ragged = (n % block_n) != 0                        # last tile physically short
    uneven = (tiles_total % num_chunks) != 0           # duplicated (clamped) tiles
    needs_x_mask = ragged
    needs_row_mask = ragged or uneven

    last_tile = tiles_total - 1

    def x_map(p, i):
        # Clamp so the logical "overflow" tile of an uneven split re-reads an
        # in-bounds tile; its rows are masked out via the logical row index.
        return (jnp.minimum(p * tiles_per_chunk + i, last_tile), 0)

    def t_map(p, i):
        return (jnp.minimum(p * tiles_per_chunk + i, last_tile), 0)

    def o_map(p, i):
        return (p, 0, 0)

    kernel = functools.partial(
        _ce_label_smooth_kernel,
        epsilon=float(epsilon),
        num_classes=int(num_classes),
        n_total=int(n),
        block_n=block_n,
        tiles_per_chunk=int(tiles_per_chunk),
        needs_x_mask=needs_x_mask,
        needs_row_mask=needs_row_mask,
    )

    # Honest VMEM accounting: double-buffered logits + lane-padded targets,
    # in-kernel f32 temporaries, output tile, headroom.
    needed = (2 * block_n * c * itemsize
              + 2 * block_n * 512
              + 4 * block_n * c * 4
              + 2 * 8 * 128 * 4
              + (2 << 20))
    vmem_limit = int(min(max(needed, 16 << 20),
                         max(24 << 20, min(vmem_cap - (8 << 20), 112 << 20))))

    partials = pl.pallas_call(
        kernel,
        out_shape=jax.ShapeDtypeStruct((num_chunks, 8, 128), jnp.float32),
        grid=(num_chunks, tiles_per_chunk),
        in_specs=[
            pl.BlockSpec((block_n, c), x_map),
            pl.BlockSpec((block_n, 1), t_map),
        ],
        out_specs=pl.BlockSpec((1, 8, 128), o_map),
        scratch_shapes=[pltpu.SMEM((1, 1), jnp.float32)],
        compiler_params=pltpu.CompilerParams(
            dimension_semantics=("parallel", "arbitrary"),
            vmem_limit_bytes=vmem_limit,
        ),
        cost_estimate=pl.CostEstimate(
            flops=8 * n * c,
            transcendentals=n * c + n,
            bytes_accessed=n * c * itemsize + n * 4 + num_chunks * 8 * 128 * 4,
        ),
    )(inputs, tgt2d)

    return jnp.sum(partials[:, 0, 0]) / float(n)


def _reference(inputs, targets, num_classes, epsilon=0.1):
    log_probs = jax.nn.log_softmax(inputs.astype(jnp.float32), axis=1)
    one_hot = jax.nn.one_hot(targets, num_classes, dtype=jnp.float32)
    smooth = (1.0 - epsilon) * one_hot + epsilon / num_classes
    return (-smooth * log_probs).mean(0).sum()


if __name__ == "__main__":
    num_classes = 16
    epsilon = 0.1
    key = jax.random.PRNGKey(0)
    k1, k2, k3, k4, k5, k6 = jax.random.split(key, 6)

    # Test 1: small shape, single tile, single chunk, no masking path.
    batch = 8
    logits = jax.random.normal(k1, (batch, num_classes), dtype=jnp.float32)
    labels = jax.random.randint(k2, (batch,), 0, num_classes, dtype=jnp.int32)
    loss = jax.block_until_ready(
        cross_entropy_label_smooth(logits, labels, num_classes, epsilon))
    ref = _reference(logits, labels, num_classes, epsilon)
    assert jnp.allclose(loss, ref, atol=1e-5, rtol=1e-5), (loss, ref)

    # Test 2: 2-chunk parallel grid with ragged last tile + uneven tile split
    # (exercises masking and the clamped index_map).
    batch2 = 20
    logits2 = jax.random.normal(k3, (batch2, num_classes), dtype=jnp.float32)
    labels2 = jax.random.randint(k4, (batch2,), 0, num_classes, dtype=jnp.int32)
    loss2 = jax.block_until_ready(
        cross_entropy_label_smooth(logits2, labels2, num_classes, epsilon,
                                   block_n=8))
    ref2 = _reference(logits2, labels2, num_classes, epsilon)
    assert jnp.allclose(loss2, ref2, atol=1e-5, rtol=1e-5), (loss2, ref2)

    # Test 3: larger batch, automatic byte-based tile sizing, clean 2-chunk
    # split with no masking.
    batch3 = 4096
    logits3 = jax.random.normal(k5, (batch3, num_classes), dtype=jnp.float32)
    labels3 = jax.random.randint(k6, (batch3,), 0, num_classes, dtype=jnp.int32)
    loss3 = jax.block_until_ready(
        cross_entropy_label_smooth(logits3, labels3, num_classes, epsilon))
    ref3 = _reference(logits3, labels3, num_classes, epsilon)
    assert jnp.allclose(loss3, ref3, atol=1e-5, rtol=1e-5), (loss3, ref3)

    print("KERNEL_OK")
</pallas_src>

<mosaic_0001>
module attributes {stable_mosaic.version = 11 : i64} {
  func.func @_ce_label_smooth_kernel(%arg0: i32, %arg1: i32, %arg2: memref<8x16xf32, #tpu.memory_space<vmem>>, %arg3: memref<8x1xi32, #tpu.memory_space<vmem>>, %arg4: memref<1x8x128xf32, #tpu.memory_space<vmem>>, %arg5: memref<1x1xf32, #tpu.memory_space<smem>>) attributes {dimension_semantics = [#tpu.dimension_semantics<parallel>, #tpu.dimension_semantics<arbitrary>], iteration_bounds = array<i64: 1, 1>, scalar_prefetch = 0 : i64, scratch_operands = 1 : i64, tpu.core_type = #tpu.core_type<tc>, window_params = [{transform_indices = @transform_0, window_bounds = array<i64: 8, 16>}, {transform_indices = @transform_1, window_bounds = array<i64: 8, 1>}, {transform_indices = @transform_2, window_bounds = array<i64: 1, 8, 128>}]} {
    %c0_i32 = arith.constant 0 : i32
    %0 = arith.cmpi eq, %arg1, %c0_i32 : i32
    %1 = arith.extui %0 : i1 to i32
    %c0_i32_0 = arith.constant 0 : i32
    %2 = arith.cmpi ne, %1, %c0_i32_0 : i32
    scf.if %2 {
      %cst_19 = arith.constant 0.000000e+00 : f32
      %c0_20 = arith.constant 0 : index
      %c0_21 = arith.constant 0 : index
      %43 = memref.load %arg5[%c0_20, %c0_21] : memref<1x1xf32, #tpu.memory_space<smem>>
      memref.store %cst_19, %arg5[%c0_20, %c0_21] : memref<1x1xf32, #tpu.memory_space<smem>>
    } else {
    }
    %c0 = arith.constant 0 : index
    %c0_1 = arith.constant 0 : index
    %3 = vector.load %arg2[%c0, %c0_1] : memref<8x16xf32, #tpu.memory_space<vmem>>, vector<8x16xf32>
    %c0_2 = arith.constant 0 : index
    %c0_3 = arith.constant 0 : index
    %4 = vector.load %arg3[%c0_2, %c0_3] : memref<8x1xi32, #tpu.memory_space<vmem>>, vector<8x1xi32>
    %cst = arith.constant dense<0xFF800000> : vector<8xf32>
    %5 = vector.multi_reduction <maximumf>, %3, %cst [1] : vector<8x16xf32> to vector<8xf32>
    %6 = vector.shape_cast %5 : vector<8xf32> to vector<8x1xf32>
    %7 = vector.broadcast %6 : vector<8x1xf32> to vector<8x16xf32>
    %8 = arith.subf %3, %7 : vector<8x16xf32>
    %9 = math.exp %8 : vector<8x16xf32>
    %cst_4 = arith.constant dense<0.000000e+00> : vector<8xf32>
    %10 = vector.multi_reduction <add>, %9, %cst_4 [1] : vector<8x16xf32> to vector<8xf32>
    %11 = vector.shape_cast %10 : vector<8xf32> to vector<8x1xf32>
    %12 = math.log %11 : vector<8x1xf32>
    %13 = arith.addf %6, %12 : vector<8x1xf32>
    %14 = tpu.iota {dimensions = array<i32: 1>} : vector<8x16xi32>
    %15 = vector.broadcast %4 : vector<8x1xi32> to vector<8x16xi32>
    %16 = arith.cmpi eq, %14, %15 : vector<8x16xi32>
    %cst_5 = arith.constant 0.000000e+00 : f32
    %17 = vector.broadcast %cst_5 : f32 to vector<8x16xf32>
    %18 = arith.select %16, %3, %17 : vector<8x16xi1>, vector<8x16xf32>
    %cst_6 = arith.constant dense<0.000000e+00> : vector<8xf32>
    %19 = vector.multi_reduction <add>, %18, %cst_6 [1] : vector<8x16xf32> to vector<8xf32>
    %20 = vector.shape_cast %19 : vector<8xf32> to vector<8x1xf32>
    %21 = arith.subf %20, %13 : vector<8x1xf32>
    %cst_7 = arith.constant dense<0.000000e+00> : vector<8xf32>
    %22 = vector.multi_reduction <add>, %3, %cst_7 [1] : vector<8x16xf32> to vector<8xf32>
    %23 = vector.shape_cast %22 : vector<8xf32> to vector<8x1xf32>
    %cst_8 = arith.constant 1.600000e+01 : f32
    %24 = vector.broadcast %cst_8 : f32 to vector<8x1xf32>
    %25 = arith.mulf %24, %13 : vector<8x1xf32>
    %26 = arith.subf %23, %25 : vector<8x1xf32>
    %cst_9 = arith.constant 0.899999976 : f32
    %27 = vector.broadcast %cst_9 : f32 to vector<8x1xf32>
    %28 = arith.mulf %27, %21 : vector<8x1xf32>
    %cst_10 = arith.constant 6.250000e-03 : f32
    %29 = vector.broadcast %cst_10 : f32 to vector<8x1xf32>
    %30 = arith.mulf %29, %26 : vector<8x1xf32>
    %31 = arith.addf %28, %30 : vector<8x1xf32>
    %c0_11 = arith.constant 0 : index
    %c0_12 = arith.constant 0 : index
    %32 = memref.load %arg5[%c0_11, %c0_12] : memref<1x1xf32, #tpu.memory_space<smem>>
    %33 = vector.shape_cast %31 : vector<8x1xf32> to vector<1x8x1xf32>
    %cst_13 = arith.constant dense<0.000000e+00> : vector<1xf32>
    %34 = vector.multi_reduction <add>, %33, %cst_13 [1, 2] : vector<1x8x1xf32> to vector<1xf32>
    %35 = vector.shape_cast %34 : vector<1xf32> to vector<1x1x1xf32>
    %36 = vector.extract %35[0, 0, 0] : f32 from vector<1x1x1xf32>
    %cst_14 = arith.constant 0.000000e+00 : f32
    %37 = arith.subf %cst_14, %36 : f32
    %38 = arith.addf %32, %37 : f32
    %c0_15 = arith.constant 0 : index
    %c0_16 = arith.constant 0 : index
    %39 = memref.load %arg5[%c0_15, %c0_16] : memref<1x1xf32, #tpu.memory_space<smem>>
    memref.store %38, %arg5[%c0_15, %c0_16] : memref<1x1xf32, #tpu.memory_space<smem>>
    %c0_i32_17 = arith.constant 0 : i32
    %40 = arith.cmpi eq, %arg1, %c0_i32_17 : i32
    %41 = arith.extui %40 : i1 to i32
    %c0_i32_18 = arith.constant 0 : i32
    %42 = arith.cmpi ne, %41, %c0_i32_18 : i32
    scf.if %42 {
      %c0_19 = arith.constant 0 : index
      %c0_20 = arith.constant 0 : index
      %43 = memref.load %arg5[%c0_19, %c0_20] : memref<1x1xf32, #tpu.memory_space<smem>>
      %44 = vector.broadcast %43 : f32 to vector<1x8x128xf32>
      %c0_21 = arith.constant 0 : index
      %c0_22 = arith.constant 0 : index
      %c0_23 = arith.constant 0 : index
      %45 = vector.load %arg4[%c0_21, %c0_22, %c0_23] : memref<1x8x128xf32, #tpu.memory_space<vmem>>, vector<1x8x128xf32>
      tpu.vector_store %arg4[%c0_21, %c0_22, %c0_23], %44 {strides = array<i32>} : memref<1x8x128xf32, #tpu.memory_space<vmem>>, vector<1x8x128xf32>,
    } else {
    }
    return
  }
  func.func @transform_0(%arg0: i32, %arg1: i32) -> (i32, i32) {
    %c1_i32 = arith.constant 1 : i32
    %0 = arith.muli %arg0, %c1_i32 : i32
    %1 = arith.addi %0, %arg1 : i32
    %c0_i32 = arith.constant 0 : i32
    %2 = arith.minsi %1, %c0_i32 : i32
    %c0_i32_0 = arith.constant 0 : i32
    %c0_i32_1 = arith.constant 0 : i32
    return %2, %c0_i32_0 : i32, i32
  }
  func.func @transform_1(%arg0: i32, %arg1: i32) -> (i32, i32) {
    %c1_i32 = arith.constant 1 : i32
    %0 = arith.muli %arg0, %c1_i32 : i32
    %1 = arith.addi %0, %arg1 : i32
    %c0_i32 = arith.constant 0 : i32
    %2 = arith.minsi %1, %c0_i32 : i32
    %c0_i32_0 = arith.constant 0 : i32
    %c0_i32_1 = arith.constant 0 : i32
    return %2, %c0_i32_0 : i32, i32
  }
  func.func @transform_2(%arg0: i32, %arg1: i32) -> (i32, i32, i32) {
    %c0_i32 = arith.constant 0 : i32
    %c0_i32_0 = arith.constant 0 : i32
    %c0_i32_1 = arith.constant 0 : i32
    return %arg0, %c0_i32, %c0_i32_0 : i32, i32, i32
  }
}

</mosaic_0001>

<bundles_post_ra>
// kernel: tpu_custom_call.1
= control target key start
LH: loop header
LB: loop body
LE: loop exit
PB: predicated region body
PF: predicated region fallthrough
CT: control target
= control target key end

     0   :  { %vm74_vm0 = vcmask 130048   ;;  %s226_s0 = inlined_call_operand.vmem [shape: f32[8,16], index: 0, kind: input, shape index: {}]   ;;  %s227_s1 = inlined_call_operand.vmem [shape: s32[8,1], index: 1, kind: input, shape index: {}]   ;;  %s228_s2 = inlined_call_operand.hbm [shape: f32[1,8,128], index: 2, kind: output, shape index: {}]  }
   0x1   :  { %v72_v0 = vld [vmem:[%s226_s0] sm:$0xff] }
   0x2   :  { %7 = vsyncpa [#allocation4], 0  ;;  %v75_v1 = vsel %vm74_vm0, %v72_v0, -inf  ;;  %v187_v2 = vmov 0   ;;  %v73_v3 = vld [vmem:[%s227_s1] sm:$0xff]  ;;  %v87_v7 = vlaneseq  ;;  %v98_v14 = vsel %vm74_vm0, %v72_v0, 0.0 }
   0x3   :  { %158 = vset.pattern.permute.xlu0 %v187_v2  ;;  %vm107_vm2 = vcmask 7168   ;;  %s188_s0 = smov [#allocation3]  }
   0x4   :  { %76 = vmax.xlane.f32.xlu0 %v75_v1  ;;  %v88_v8 = vand.u32 127, %v87_v7  ;;  %s134_s1 = sshll.u32 %s188_s0, 4  ;;  %s135_s1 = int_to_ptr.vmem [resolvable:$true] %s134_s1 }
   0x5   :  { %s163_s15 = scalar_lea.vmem %s135_s1, 128  ;;  %p168_p1 = scmp.lt.s32.totalorder %s135_s1, %s135_s1 }
   0x6   :  { %p164_p0 = scmp.ne.s32.totalorder %s135_s1, %s163_s15  ;;  %p169_p2 = scmp.lt.s32.totalorder %s163_s15, %s163_s15 }
   0x8   :  { %p170_p3 = por %p169_p2, %p168_p1 }
   0xa   :  { %p171_p4 = pnand %p170_p3, %p164_p0 }
  0x1a   :  { %90 = vperm.xlu0 %158, %v73_v3  }
  0x91   :  { %v77_v4 = vpop.xlane.xlu0 %76 }
  0x92   :  { %v78_v5 = vsub.f32 %v72_v0, %v77_v4 }
  0x94   :  { %v79_v6 = vmul.f32 1.442695, %v78_v5 }
  0x96   :  { %159 = vpow2.f32 %v79_v6 }
  0x99   :  { %v91_v9 = vpop.permute.xlu0 %90 }
  0x9a   :  { %vm92_vm1 = vcmp.eq.s32.totalorder %v88_v8, %v91_v9 }
  0x9b   :  { %v93_v11 = vsel %vm92_vm1, %v72_v0, 0.0 }
  0x9c   :  { %v94_v13 = vsel %vm74_vm0, %v93_v11, 0.0 }
  0xa0   :  { %v160_v10 = vpop.eup %159 }
  0xa1   :  { %v81_v12 = vsel %vm74_vm0, %v160_v10, 0.0 }
  0xa2   :  { %82 = vadd.xlane.f32.xlu1 %v81_v12 }
  0xa6   :  { %95 = vadd.xlane.f32.xlu1 %v94_v13 }
  0xaa   :  { %99 = vadd.xlane.f32.xlu1 %v98_v14 }
 0x12f   :  { %v83_v15 = vpop.xlane.xlu1 %82 }
 0x130   :  { %161 = vlog2.f32 %v83_v15 }
 0x133   :  { %v96_v16 = vpop.xlane.xlu1 %95 }
 0x137   :  { %v100_v20 = vpop.xlane.xlu1 %99 }
 0x13a   :  { %v162_v17 = vpop.eup %161 }
 0x13b   :  { %v85_v18 = vmul.f32 0.6931472, %v162_v17 }
 0x13d   :  { %v86_v19 = vadd.f32 %v85_v18, %v77_v4 }
 0x13f   :  { %v97_v21 = vsub.f32 %v96_v16, %v86_v19  ;;  %v101_v22 = vmul.f32 16.0, %v86_v19 }
 0x141   :  { %v102_v23 = vsub.f32 %v100_v20, %v101_v22  ;;  %v103_v24 = vmul.f32 0.9, %v97_v21 }
 0x143   :  { %v104_v25 = vmul.f32 0.00625, %v102_v23 }
 0x145   :  { %v105_v26 = vadd.f32 %v104_v25, %v103_v24 }
 0x147   :  { %v108_v27 = vsel %vm107_vm2, %v105_v26, 0.0 }
 0x148   :  { %109 = vadd.xlane.f32.xlu1 %v108_v27 }
 0x1d5   :  { %v110_v28 = vpop.xlane.xlu1 %109 }
 0x1d6   :  { %v111_v29 = vrot.slane %v110_v28, 4 }
 0x1d8   :  { %v112_v30 = vadd.f32 %v111_v29, %v110_v28 }
 0x1da   :  { %v113_v31 = vrot.slane %v112_v30, 2 }
 0x1dc   :  { %v114_v32 = vadd.f32 %v113_v31, %v112_v30 }
 0x1de   :  { %v115_v33 = vrot.slane %v114_v32, 1 }
 0x1e0   :  { %v116_v34 = vadd.f32 %v115_v33, %v114_v32 }
 0x1e2   :  { %154 = vpush %v116_v34 }
 0x213   :  { %s155_s13 = spop %154 }
 0x214   :  { %s118_s14 = ssub.f32 0.0, %s155_s13 }
 0x216   :  { %v126_v35 = vstv %s118_s14 }
 0x217   :  { %127 = vst [vmem:[#allocation3] sm:$0xff] %v126_v35 }
 0x218   :  { %174 = shalt.err (!%p171_p4)
}
 0x219   :  { %s175_s18 = scalar_lea.hbm %s228_s2, 128 }
 0x21a   :  { %p176_p5 = scmp.ne.s32.totalorder %s228_s2, %s175_s18  ;;  %p179_p6 = scmp.lt.u32.totalorder %s175_s18, %s228_s2 }
 0x21c   :  { %p181_p7 = pnand %p179_p6, %p176_p5 }
 0x21e   :  { %184 = shalt.err (!%p181_p7)
}
 0x21f   :  { %137 = dma.vmem_to_hbm [thread:$0]  %s135_s1, 128, %s228_s2, [#allocation4]  }
 0x220   :  { %185 = dma.done.wait [#allocation4], 128  }
 0x221   :  { %186 = vsyncadd [#allocation4], 4294967168 }
 0x222   :  { %141 = vsyncpa [#allocation4], 1 }

</bundles_post_ra>
